<compile_context>
chip_gen: v6e
topology: v6e:2x2x1
jax: 0.10.0
libtpu: 0.0.40
codegen_flags: <defaults>
</compile_context>

<pallas_src>
import jax
import jax.numpy as jnp
from jax.experimental import pallas as pl
from jax.experimental.pallas import tpu as pltpu

EMBED_DIM = 32           # embedding_dim    (C)
FEATURE_MAPS = 16        # feature_map_size (F) -- small synthetic size
KERNEL_SIZES = (3, 4, 5)
NUM_BRANCHES = len(KERNEL_SIZES)
KMAX = max(KERNEL_SIZES)
BATCH = 16
SEQ_LEN = 16
BATCH_TILE = 8           # batch rows per grid step (multiple of 8 sublanes)

# Set to jnp.bfloat16 on v6e/v7x if reduced MXU input precision is acceptable
# (accumulation stays f32 via preferred_element_type).
MXU_DTYPE = jnp.float32


def sentiment_cnn_kernel(x_ref, w_ref, bm_ref, wfc_ref, bfc_ref, out_ref):
    x = x_ref[...]                                   # (TB, L, C) f32
    TB, L, C = x.shape

    # ---- in-kernel im2col, built ONCE (not per tap / per branch) -------------
    # Zero-pad along L so every shifted view keeps L rows; padded tail
    # positions are killed later by the -inf entries in the fused bias/mask.
    xpad = jnp.concatenate(
        [x, jnp.zeros((TB, KMAX - 1, C), x.dtype)], axis=1)      # (TB, L+KMAX-1, C)
    taps = [xpad[:, j:j + L, :].reshape(TB * L, C) for j in range(KMAX)]
    xcol = jnp.concatenate(taps, axis=-1)                        # (TB*L, KMAX*C)

    # ---- one fused MXU matmul for all taps and all three conv branches -------
    # M = TB*L (=128), K = KMAX*C (=160), N = 3*F (=48)
    conv = jnp.dot(xcol.astype(MXU_DTYPE), w_ref[...].astype(MXU_DTYPE),
                   preferred_element_type=jnp.float32)           # (TB*L, NF) f32
    NF = conv.shape[-1]

    # ---- fused conv-bias + validity mask (single VPU add), then max, ReLU -----
    # bm[t, n] = bias[n] if position t is valid for n's branch else -inf.
    conv = conv.reshape(TB, L, NF) + bm_ref[...][None, :, :]     # (TB, L, NF)
    feat = jnp.maximum(jnp.max(conv, axis=1), 0.0)               # (TB, NF)
    # TODO(synk): dropout skipped (identity at inference).

    # ---- fc (3F -> 1): VPU multiply + lane reduction (no N=1 MXU matmul) ------
    logit = jnp.sum(feat * wfc_ref[...], axis=-1, keepdims=True) + bfc_ref[...]
    # NOTE: at production batch sizes, emit a lane-dense output slab instead of
    # a last-dim-1 store; negligible at this size.
    out_ref[...] = jax.nn.sigmoid(logit)                         # (TB, 1)


def sentiment_cnn_forward(embeds, kparams, *, batch_tile=BATCH_TILE):
    B, L, C = embeds.shape
    assert B % batch_tile == 0, "batch must be a multiple of the batch tile"
    w, bm, wfc, bfc = kparams['w'], kparams['bm'], kparams['wfc'], kparams['bfc']

    def full(shape):
        # Constant param: same block every grid step (never re-DMA'd).
        return pl.BlockSpec(shape, lambda b, _n=len(shape): (0,) * _n)

    return pl.pallas_call(
        sentiment_cnn_kernel,
        out_shape=jax.ShapeDtypeStruct((B, 1), jnp.float32),
        grid=(B // batch_tile,),
        in_specs=[
            pl.BlockSpec((batch_tile, L, C), lambda b: (b, 0, 0)),
            full(w.shape),
            full(bm.shape),
            full(wfc.shape),
            full(bfc.shape),
        ],
        out_specs=pl.BlockSpec((batch_tile, 1), lambda b: (b, 0)),
        compiler_params=pltpu.CompilerParams(
            dimension_semantics=("parallel",)),
    )(embeds, w, bm, wfc, bfc)


def init_torch_params(key):
    """Deterministic params in the PyTorch layout: conv (F, C, k), fc (1, 3F)."""
    keys = jax.random.split(key, 2 * NUM_BRANCHES + 2)
    conv_ws, conv_bs = [], []
    for i, k in enumerate(KERNEL_SIZES):
        conv_ws.append(0.1 * jax.random.normal(
            keys[2 * i], (FEATURE_MAPS, EMBED_DIM, k), jnp.float32))
        conv_bs.append(0.1 * jax.random.normal(
            keys[2 * i + 1], (FEATURE_MAPS,), jnp.float32))
    fc_w = 0.1 * jax.random.normal(
        keys[-2], (1, NUM_BRANCHES * FEATURE_MAPS), jnp.float32)
    fc_b = 0.1 * jax.random.normal(keys[-1], (1,), jnp.float32)
    return conv_ws, conv_bs, fc_w, fc_b


def to_kernel_params(conv_ws, conv_bs, fc_w, fc_b, *, seq_len=SEQ_LEN):
    """Pack params for the fused kernel.

    w : (KMAX*C, 3F) with w[j*C + c, i*F + f] = conv_w_i[f, c, j] (zero for taps
        j >= k_i), matching the im2col column order x[t + j, c].
    bm: (L, 3F) fused conv-bias + validity mask: bias where the branch window
        fits (t <= L - k_i), -inf otherwise (so padded/tail positions never win
        the time max-pool).
    wfc: (1, 3F) fc weight; bfc: (1, 1) fc bias.
    """
    C, F, L = EMBED_DIM, FEATURE_MAPS, seq_len
    w_fused = jnp.zeros((KMAX * C, NUM_BRANCHES * F), jnp.float32)
    for i, (w, k) in enumerate(zip(conv_ws, KERNEL_SIZES)):
        w_kcf = jnp.transpose(w, (2, 1, 0)).reshape(k * C, F)    # (k*C, F)
        w_fused = w_fused.at[:k * C, i * F:(i + 1) * F].set(w_kcf)

    t = jnp.arange(L)[:, None]                                   # (L, 1)
    cols = []
    for b, k in zip(conv_bs, KERNEL_SIZES):
        valid = t < (L - k + 1)                                  # (L, 1)
        cols.append(jnp.where(valid, b[None, :], -jnp.inf))      # (L, F)
    bias_mask = jnp.concatenate(cols, axis=1).astype(jnp.float32)  # (L, 3F)

    return {
        'w': w_fused,
        'bm': bias_mask,
        'wfc': fc_w.reshape(1, NUM_BRANCHES * F),
        'bfc': fc_b.reshape(1, 1),
    }


def reference_forward(embeds, conv_ws, conv_bs, fc_w, fc_b):
    """Pure-JAX mirror of the PyTorch forward (eval mode)."""
    xt = jnp.transpose(embeds, (0, 2, 1))                  # (B, C, L), like permute(0,2,1)
    feats = []
    for w, b, k in zip(conv_ws, conv_bs, KERNEL_SIZES):
        Lout = embeds.shape[1] - k + 1
        conv = jnp.stack(
            [jnp.einsum('bcw,fcw->bf', xt[:, :, t:t + k], w) for t in range(Lout)],
            axis=2) + b[None, :, None]                     # (B, F, Lout)
        feats.append(jnp.max(jax.nn.relu(conv), axis=2))   # (B, F)
    feat = jnp.concatenate(feats, axis=1)                  # (B, 3F)
    return jax.nn.sigmoid(feat @ fc_w.T + fc_b)            # (B, 1)


if __name__ == "__main__":
    key = jax.random.PRNGKey(0)
    k_x, k_p = jax.random.split(key)

    embeds = jax.random.normal(k_x, (BATCH, SEQ_LEN, EMBED_DIM), jnp.float32)
    conv_ws, conv_bs, fc_w, fc_b = init_torch_params(k_p)
    kparams = to_kernel_params(conv_ws, conv_bs, fc_w, fc_b, seq_len=SEQ_LEN)

    out = sentiment_cnn_forward(embeds, kparams)
    out = jax.block_until_ready(out)

    ref = reference_forward(embeds, conv_ws, conv_bs, fc_w, fc_b)
    assert out.shape == (BATCH, 1)
    assert jnp.allclose(out, ref, atol=1e-4, rtol=1e-4), (out, ref)

    print("KERNEL_OK")
</pallas_src>

<mosaic_0001>
module attributes {stable_mosaic.version = 11 : i64} {
  func.func @sentiment_cnn_kernel(%arg0: i32, %arg1: memref<8x16x32xf32, #tpu.memory_space<vmem>>, %arg2: memref<160x48xf32, #tpu.memory_space<vmem>>, %arg3: memref<16x48xf32, #tpu.memory_space<vmem>>, %arg4: memref<1x48xf32, #tpu.memory_space<vmem>>, %arg5: memref<1x1xf32, #tpu.memory_space<vmem>>, %arg6: memref<8x1xf32, #tpu.memory_space<vmem>>) attributes {dimension_semantics = [#tpu.dimension_semantics<parallel>], iteration_bounds = array<i64: 2>, scalar_prefetch = 0 : i64, scratch_operands = 0 : i64, tpu.core_type = #tpu.core_type<tc>, window_params = [{transform_indices = @transform_0, window_bounds = array<i64: 8, 16, 32>}, {pipeline_mode = #tpu.pipeline_mode<synchronous>, transform_indices = @transform_1, window_bounds = array<i64: 160, 48>}, {pipeline_mode = #tpu.pipeline_mode<synchronous>, transform_indices = @transform_2, window_bounds = array<i64: 16, 48>}, {pipeline_mode = #tpu.pipeline_mode<synchronous>, transform_indices = @transform_3, window_bounds = array<i64: 1, 48>}, {pipeline_mode = #tpu.pipeline_mode<synchronous>, transform_indices = @transform_4, window_bounds = array<i64: 1, 1>}, {transform_indices = @transform_5, window_bounds = array<i64: 8, 1>}]} {
    %c0 = arith.constant 0 : index
    %c0_0 = arith.constant 0 : index
    %c0_1 = arith.constant 0 : index
    %0 = vector.load %arg1[%c0, %c0_0, %c0_1] : memref<8x16x32xf32, #tpu.memory_space<vmem>>, vector<8x16x32xf32>
    %cst = arith.constant 0.000000e+00 : f32
    %1 = vector.broadcast %cst : f32 to vector<8x4x32xf32>
    %2 = tpu.concatenate %0, %1 in 1 : vector<8x16x32xf32>, vector<8x4x32xf32> -> vector<8x20x32xf32>
    %3 = vector.extract_strided_slice %2 {offsets = [0, 0, 0], sizes = [8, 16, 32], strides = [1, 1, 1]} : vector<8x20x32xf32> to vector<8x16x32xf32>
    %4 = vector.shape_cast %3 : vector<8x16x32xf32> to vector<128x32xf32>
    %5 = vector.extract_strided_slice %2 {offsets = [0, 1, 0], sizes = [8, 16, 32], strides = [1, 1, 1]} : vector<8x20x32xf32> to vector<8x16x32xf32>
    %6 = vector.shape_cast %5 : vector<8x16x32xf32> to vector<128x32xf32>
    %7 = vector.extract_strided_slice %2 {offsets = [0, 2, 0], sizes = [8, 16, 32], strides = [1, 1, 1]} : vector<8x20x32xf32> to vector<8x16x32xf32>
    %8 = vector.shape_cast %7 : vector<8x16x32xf32> to vector<128x32xf32>
    %9 = vector.extract_strided_slice %2 {offsets = [0, 3, 0], sizes = [8, 16, 32], strides = [1, 1, 1]} : vector<8x20x32xf32> to vector<8x16x32xf32>
    %10 = vector.shape_cast %9 : vector<8x16x32xf32> to vector<128x32xf32>
    %11 = vector.extract_strided_slice %2 {offsets = [0, 4, 0], sizes = [8, 16, 32], strides = [1, 1, 1]} : vector<8x20x32xf32> to vector<8x16x32xf32>
    %12 = vector.shape_cast %11 : vector<8x16x32xf32> to vector<128x32xf32>
    %13 = tpu.concatenate %4, %6, %8, %10, %12 in 1 : vector<128x32xf32>, vector<128x32xf32>, vector<128x32xf32>, vector<128x32xf32>, vector<128x32xf32> -> vector<128x160xf32>
    %c0_2 = arith.constant 0 : index
    %c0_3 = arith.constant 0 : index
    %14 = vector.load %arg2[%c0_2, %c0_3] : memref<160x48xf32, #tpu.memory_space<vmem>>, vector<160x48xf32>
    %cst_4 = arith.constant dense<0.000000e+00> : vector<128x48xf32>
    %15 = tpu.matmul %13, %14, %cst_4 {dimension_numbers = #tpu.dot_dimension_numbers<[1], [0], [0], [1], [0, 0, 1, 1], [], []>} : vector<128x160xf32>, vector<160x48xf32>, vector<128x48xf32> -> vector<128x48xf32>
    %16 = vector.shape_cast %15 : vector<128x48xf32> to vector<8x16x48xf32>
    %c0_5 = arith.constant 0 : index
    %c0_6 = arith.constant 0 : index
    %17 = vector.load %arg3[%c0_5, %c0_6] : memref<16x48xf32, #tpu.memory_space<vmem>>, vector<16x48xf32>
    %18 = vector.shape_cast %17 : vector<16x48xf32> to vector<1x16x48xf32>
    %19 = vector.broadcast %18 : vector<1x16x48xf32> to vector<8x16x48xf32>
    %20 = arith.addf %16, %19 : vector<8x16x48xf32>
    %cst_7 = arith.constant dense<0xFF800000> : vector<8x48xf32>
    %21 = vector.multi_reduction <maximumf>, %20, %cst_7 [1] : vector<8x16x48xf32> to vector<8x48xf32>
    %cst_8 = arith.constant 0.000000e+00 : f32
    %22 = vector.broadcast %cst_8 : f32 to vector<8x48xf32>
    %23 = arith.maximumf %21, %22 : vector<8x48xf32>
    %c0_9 = arith.constant 0 : index
    %c0_10 = arith.constant 0 : index
    %24 = vector.load %arg4[%c0_9, %c0_10] : memref<1x48xf32, #tpu.memory_space<vmem>>, vector<1x48xf32>
    %25 = vector.broadcast %24 : vector<1x48xf32> to vector<8x48xf32>
    %26 = arith.mulf %23, %25 : vector<8x48xf32>
    %cst_11 = arith.constant dense<0.000000e+00> : vector<8xf32>
    %27 = vector.multi_reduction <add>, %26, %cst_11 [1] : vector<8x48xf32> to vector<8xf32>
    %28 = vector.shape_cast %27 : vector<8xf32> to vector<8x1xf32>
    %c0_12 = arith.constant 0 : index
    %c0_13 = arith.constant 0 : index
    %29 = vector.load %arg5[%c0_12, %c0_13] : memref<1x1xf32, #tpu.memory_space<vmem>>, vector<1x1xf32>
    %30 = vector.broadcast %29 : vector<1x1xf32> to vector<8x1xf32>
    %31 = arith.addf %28, %30 : vector<8x1xf32>
    %32 = arith.negf %31 : vector<8x1xf32>
    %33 = math.exp %32 : vector<8x1xf32>
    %cst_14 = arith.constant 1.000000e+00 : f32
    %34 = vector.broadcast %cst_14 : f32 to vector<8x1xf32>
    %35 = arith.addf %34, %33 : vector<8x1xf32>
    %36 = arith.divf %34, %35 : vector<8x1xf32>
    %c0_15 = arith.constant 0 : index
    %c0_16 = arith.constant 0 : index
    %37 = vector.load %arg6[%c0_15, %c0_16] : memref<8x1xf32, #tpu.memory_space<vmem>>, vector<8x1xf32>
    tpu.vector_store %arg6[%c0_15, %c0_16], %36 {strides = array<i32>} : memref<8x1xf32, #tpu.memory_space<vmem>>, vector<8x1xf32>,
    return
  }
  func.func @transform_0(%arg0: i32) -> (i32, i32, i32) {
    %c0_i32 = arith.constant 0 : i32
    %c0_i32_0 = arith.constant 0 : i32
    %c0_i32_1 = arith.constant 0 : i32
    return %arg0, %c0_i32, %c0_i32_0 : i32, i32, i32
  }
  func.func @transform_1(%arg0: i32) -> (i32, i32) {
    %c0_i32 = arith.constant 0 : i32
    %c0_i32_0 = arith.constant 0 : i32
    %c0_i32_1 = arith.constant 0 : i32
    return %c0_i32, %c0_i32_0 : i32, i32
  }
  func.func @transform_2(%arg0: i32) -> (i32, i32) {
    %c0_i32 = arith.constant 0 : i32
    %c0_i32_0 = arith.constant 0 : i32
    %c0_i32_1 = arith.constant 0 : i32
    return %c0_i32, %c0_i32_0 : i32, i32
  }
  func.func @transform_3(%arg0: i32) -> (i32, i32) {
    %c0_i32 = arith.constant 0 : i32
    %c0_i32_0 = arith.constant 0 : i32
    %c0_i32_1 = arith.constant 0 : i32
    return %c0_i32, %c0_i32_0 : i32, i32
  }
  func.func @transform_4(%arg0: i32) -> (i32, i32) {
    %c0_i32 = arith.constant 0 : i32
    %c0_i32_0 = arith.constant 0 : i32
    %c0_i32_1 = arith.constant 0 : i32
    return %c0_i32, %c0_i32_0 : i32, i32
  }
  func.func @transform_5(%arg0: i32) -> (i32, i32) {
    %c0_i32 = arith.constant 0 : i32
    %c0_i32_0 = arith.constant 0 : i32
    return %arg0, %c0_i32 : i32, i32
  }
}

</mosaic_0001>

<bundles_post_ra>
// kernel: tpu_custom_call.1
= control target key start
LH: loop header
LB: loop body
LE: loop exit
PB: predicated region body
PF: predicated region fallthrough
CT: control target
= control target key end

     0   :  { %s1842_s0 = inlined_call_operand.vmem [shape: f32[16,16,32], index: 0, kind: input, shape index: {}]   ;;  %s1843_s1 = inlined_call_operand.vmem [shape: f32[160,48], index: 1, kind: input, shape index: {}]   ;;  %s1844_s2 = inlined_call_operand.hbm [shape: f32[16,48], index: 2, kind: input, shape index: {}]   ;;  %s1845_s3 = inlined_call_operand.vmem [shape: f32[1,48], index: 3, kind: input, shape index: {}]   ;;  %s1846_s4 = inlined_call_operand.<no memory space> [shape: f32[1,1], index: 4, kind: input, shape index: {}]   ;;  %s1847_s5 = inlined_call_operand.vmem [shape: f32[16,1], index: 5, kind: output, shape index: {}]  }
   0x1   :  { %v10_v0 = vstv %s1846_s4 }
   0x2   :  { %11 = vst [vmem:[#allocation2] sm:$0x1] %v10_v0 }
   0x3   :  { %12 = vsyncpa [#allocation4], 0  ;;  %s1319_s20 = smov 0  }
   0x4 LB: > { %s1325_s21 = sadd.s32 4294967295, %s1277_s20   ;;  %p1036_p0 = scmp.ge.s32.totalorder %s1277_s20, 1  ;;  %s1277_s20 = sphi %s1319_s20, %s18_s20  }
   0x5   : > { %p159_p1 = scmp.lt.s32.totalorder %s1277_s20, 3  ;;  %s1279_s22 = smov [#allocation3]  }
   0x6   : > { %s174_s4 = sshll.u32 %s1279_s22, 4  ;;  %p1115_p3 = scmp.eq.s32.totalorder %s1325_s21, 0  ;;  %s175_s4 = int_to_ptr.vmem [resolvable:$true] %s174_s4 }
   0x7   : > { %p1329_p2 = pnand %p1036_p0, %p159_p1  ;;  %s1252_s24 = scalar_lea.vmem %s175_s4, 256 }
   0x8   : > { %p1253_p7 = scmp.ne.s32.totalorder %s175_s4, %s1252_s24  ;;  %p1260_p10 = scmp.lt.s32.totalorder %s175_s4, %s175_s4 }
   0x9   : > { %p1111_p4 = pneg %p1329_p2  ;;  %p1261_p11 = scmp.lt.s32.totalorder %s1252_s24, %s1252_s24 }
   0xb   : > { %p1112_p5 = pnand %p1115_p3, %p1111_p4  ;;  %p1262_p12 = por %p1261_p11, %p1260_p10 }
   0xd   : > { %p1243_p6 = pneg %p1112_p5 }
   0xf   : > { %p1255_p8 = pnand %p1253_p7, %p1243_p6 }
  0x11   : > { %p1256_p9 = pneg %p1255_p8 }
  0x13   : > { %p1263_p13 = pnand %p1262_p12, %p1256_p9 }
  0x15   : > { %1266 = shalt.err (!%p1263_p13)
}
  0x16   : > { %s1280_s25 = smov 128   ;;  %s1281_s26 = smov 8  }
  0x17   : > { %1114 = dma.hbm_to_vmem [thread:$0]  (!%p1112_p5), %s1844_s2, 256, %s175_s4, [#allocation4], %s1280_s25, %s1280_s25, %s1281_s26  }
  0x18   : > { %206 = sbr.rel (%p1329_p2) target bundleno = 601 (0x259), region = 40 }
  0x1d   : > { %1272 = dma.done.wait (%p1115_p3), [#allocation4], 256  }
  0x1e   : > { %1274 = vsyncadd (%p1115_p3), [#allocation4], 4294967040  ;;  %s1041_s29 = sshll.u32 %s1325_s21, 3  ;;  %v1282_v1 = vmov 0.0   ;;  %vm278_vm0 = vcmask 1046528   ;;  %vm346_vm1 = vcmask 1044480  }
  0x1f   : > { %p235_p0 = scmp.lt.s32.totalorder %s1041_s29, 15  ;;  %661 = vmatprep.subr.mxu0 %v1282_v1  ;;  %1067 = vmatprep.subr.mxu1 %v1282_v1  ;;  %v1356_v2 = vrot.slane %v1282_v1, 1  ;;  %v1359_v3 = vrot.slane %v1282_v1, 3  ;;  %vm312_vm2 = vcmask 1045504   ;;  %v1368_v6 = vrot.slane %v1282_v1, 2  ;;  %s1283_s9 = smov 32  }
  0x20   : > { %s1284_s10 = smov 96   ;;  %v624_v35 = vld [vmem:[%s1843_s1 + $0x78] sm:$0xff]  ;;  %v623_v36 = vld [vmem:[%s1843_s1 + $0x70] sm:$0xff]  ;;  %v622_v51 = vld [vmem:[%s1843_s1 + $0x68] sm:$0xff]  ;;  %s1285_s17 = smov 64   ;;  %vm380_vm3 = vcmask 1043456  }
  0x21   : > { %s1850_s29 = smov (!%p235_p0, %s1041_s29), 15  ;;  %662 = vmatpush1.msra.mxu0 %v624_v35  ;;  %1087 = vmatpush1.msra.mxu1 %v624_v35  ;;  %v621_v0 = vld [vmem:[%s1843_s1 + $0x60] sm:$0xff]  ;;  %vm558_vm4 = vcmask 261120   ;;  %vm575_vm5 = vcmask 523264   ;;  %vm592_vm6 = vcmask 785408   ;;  %vm824_vm7 = vcmask 392192  }
  0x22   : > { %s1066_s30 = sshll.u32 %s1850_s29, 4  ;;  %663 = vmatprep.subr.mxu0 %v1282_v1  ;;  %1068 = vmatprep.subr.mxu1 %v1282_v1  ;;  %vm929_vm8 = vcmask 1041409   ;;  %vm932_vm9 = vcmask 1042434   ;;  %vm935_vm10 = vcmask 1043459   ;;  %vm938_vm11 = vcmask 1044484   ;;  %p241_p1 = scmp.lt.s32.totalorder %s1325_s21, 1 }
  0x23   : > { %s1353_s8 = scalar_lea.vmem %s1842_s0, %s1066_s30  ;;  %664 = vmatpush1.msra.mxu0 %v623_v36  ;;  %1088 = vmatpush1.msra.mxu1 %v623_v36  ;;  %vm941_vm12 = vcmask 1045509   ;;  %vm944_vm13 = vcmask 1046534   ;;  %vm947_vm14 = vcmask 1047559   ;;  %vm967_vm15 = vcmask 7168  }
  0x24   : > { %v1362_v4 = vld [vmem:[%s1353_s8] sm:$0xff]  ;;  %v1365_v5 = vld [vmem:[%s1353_s8 + $0x8] sm:$0xff]  ;;  %v1371_v7 = vld [vmem:[%s1353_s8 + $0x10] sm:$0xff]  ;;  %665 = vmatprep.subr.mxu0 %v1282_v1  ;;  %1069 = vmatprep.subr.mxu1 %v1282_v1  ;;  %s1852_s21 = smov (!%p241_p1, %s1325_s21), 1 }
  0x25   : > { %v279_v8 = vrot.slane %v1362_v4, 1  ;;  %v280_v9 = vrot.slane %v1365_v5, 1  ;;  %v347_v10 = vrot.slane %v1362_v4, 3  ;;  %v348_v11 = vrot.slane %v1365_v5, 3  ;;  %v1378_v12 = vld [vmem:[%s1353_s8 + $0x18] sm:$0xff]  ;;  %v1383_v15 = vld [vmem:[%s1353_s8 + $0x40] sm:$0xff]  ;;  %666 = vmatpush1.msra.mxu0 %v622_v51  ;;  %1089 = vmatpush1.msra.mxu1 %v622_v51 }
  0x26   : > { %v313_v13 = vrot.slane %v1362_v4, 2  ;;  %v314_v14 = vrot.slane %v1365_v5, 2  ;;  %v1386_v16 = vld [vmem:[%s1353_s8 + $0x48] sm:$0xff]  ;;  %v284_v17 = vrot.slane %v1371_v7, 1  ;;  %v285_v18 = vrot.slane %v1378_v12, 1  ;;  %v1419_v41 = vld [vmem:[%s1353_s8 + $0x20] sm:$0xff]  ;;  %667 = vmatprep.subr.mxu0 %v1282_v1  ;;  %1070 = vmatprep.subr.mxu1 %v1282_v1 }
  0x27   : > { %v281_v19 = vsel %vm278_vm0, %v279_v8, %v280_v9  ;;  %v283_v20 = vsel %vm278_vm0, %v280_v9, %v1356_v2  ;;  %v349_v21 = vsel %vm346_vm1, %v347_v10, %v348_v11  ;;  %v351_v22 = vsel %vm346_vm1, %v348_v11, %v1359_v3  ;;  %v1432_v49 = vld [vmem:[%s1353_s8 + $0x28] sm:$0xff]  ;;  %v1435_v50 = vld [vmem:[%s1353_s8 + $0x50] sm:$0xff]  ;;  %v1446_v55 = vld [vmem:[%s1353_s8 + $0x58] sm:$0xff]  ;;  %668 = vmatpush1.msra.mxu0 %v621_v0 }
  0x28   : > { %v1132_v23 = vpack.i.bf16 %v283_v20, %v281_v19  ;;  %v1142_v24 = vpack.i.bf16 %v351_v22, %v349_v21  ;;  %v315_v25 = vsel %vm312_vm2, %v313_v13, %v314_v14  ;;  %v317_v26 = vsel %vm312_vm2, %v314_v14, %v1368_v6  ;;  %v620_v19 = vld [vmem:[%s1843_s1 + $0x58] sm:$0xff]  ;;  %669 = vmatprep.subr.mxu0 %v1282_v1  ;;  %v617_v51 = vld [vmem:[%s1843_s1 + $0x40] sm:$0xff] }
  0x29   : > { %v1137_v27 = vpack.i.bf16 %v317_v26, %v315_v25  ;;  %v286_v28 = vsel %vm278_vm0, %v284_v17, %v285_v18  ;;  %v296_v29 = vrot.slane %v1383_v15, 1  ;;  %v297_v30 = vrot.slane %v1386_v16, 1  ;;  %670 = vmatpush1.msra.mxu0 %v620_v19  ;;  %1090 = vmatpush1.msra.mxu1 %v621_v0 }
  0x2a   : > { %1133 = vrot.lane.b32.xlu0 %v1132_v23, %s1283_s9  ;;  %1143 = vrot.lane.b32.xlu1 %v1142_v24, %s1284_s10  ;;  %v318_v31 = vrot.slane %v1371_v7, 2  ;;  %v319_v32 = vrot.slane %v1378_v12, 2  ;;  %v330_v33 = vrot.slane %v1383_v15, 2  ;;  %v331_v34 = vrot.slane %v1386_v16, 2  ;;  %v619_v24 = vld [vmem:[%s1843_s1 + $0x50] sm:$0xff] }
  0x2b   : > { %v298_v37 = vsel %vm278_vm0, %v296_v29, %v297_v30  ;;  %v352_v38 = vrot.slane %v1371_v7, 3  ;;  %v353_v39 = vrot.slane %v1378_v12, 3  ;;  %v364_v40 = vrot.slane %v1383_v15, 3  ;;  %v1490_v29 = vld [vmem:[%s1353_s8 + $0x38] sm:$0xff]  ;;  %671 = vmatprep.subr.mxu0 %v1282_v1  ;;  %1071 = vmatprep.subr.mxu1 %v1282_v1 }
  0x2c   : > { %v1147_v42 = vpack.i.bf16 %v286_v28, %v298_v37  ;;  %v320_v43 = vsel %vm312_vm2, %v318_v31, %v319_v32  ;;  %v332_v44 = vsel %vm312_vm2, %v330_v33, %v331_v34  ;;  %v365_v45 = vrot.slane %v1386_v16, 3  ;;  %v1487_v28 = vld [vmem:[%s1353_s8 + $0x30] sm:$0xff]  ;;  %v1496_v33 = vld [vmem:[%s1353_s8 + $0x60] sm:$0xff]  ;;  %672 = vmatpush1.msra.mxu0 %v619_v24  ;;  %v618_v37 = vld [vmem:[%s1843_s1 + $0x48] sm:$0xff]  ;;  %1091 = vmatpush1.msra.mxu1 %v620_v19 }
  0x2d   : > { %v354_v46 = vsel %vm346_vm1, %v352_v38, %v353_v39  ;;  %v287_v47 = vsel %vm278_vm0, %v285_v18, %v1356_v2  ;;  %v299_v48 = vsel %vm278_vm0, %v297_v30, %v1356_v2  ;;  %v1152_v52 = vpack.i.bf16 %v320_v43, %v332_v44  ;;  %673 = vmatprep.subr.mxu0 %v1282_v1 }
  0x2e   : > { %1138 = vrot.lane.b32.xlu0 %v1137_v27, %s1285_s17  ;;  %1148 = vrot.lane.b32.xlu1 %v1147_v42, %s1283_s9  ;;  %v366_v53 = vsel %vm346_vm1, %v364_v40, %v365_v45  ;;  %v321_v54 = vsel %vm312_vm2, %v319_v32, %v1368_v6  ;;  %v288_v56 = vrot.slane %v1419_v41, 1  ;;  %v1162_v58 = vpack.i.bf16 %v287_v47, %v299_v48 }
  0x2f   : > { %v1157_v57 = vpack.i.bf16 %v354_v46, %v366_v53  ;;  %v333_v59 = vsel %vm312_vm2, %v331_v34, %v1368_v6  ;;  %v355_v60 = vsel %vm346_vm1, %v353_v39, %v1359_v3  ;;  %v367_v61 = vsel %vm346_vm1, %v365_v45, %v1359_v3  ;;  %v1499_v34 = vld [vmem:[%s1353_s8 + $0x68] sm:$0xff]  ;;  %674 = vmatpush1.msra.mxu0 %v618_v37 }
  0x30   : > { %v289_v62 = vrot.slane %v1432_v49, 1  ;;  %v300_v63 = vrot.slane %v1435_v50, 1  ;;  %v1167_v8 = vpack.i.bf16 %v321_v54, %v333_v59  ;;  %v301_v9 = vrot.slane %v1446_v55, 1  ;;  %1072 = vmatprep.subr.mxu1 %v1282_v1  ;;  %675 = vmatprep.subr.mxu0 %v1282_v1 }
  0x31   : > { %v322_v10 = vrot.slane %v1419_v41, 2  ;;  %v323_v11 = vrot.slane %v1432_v49, 2  ;;  %v334_v14 = vrot.slane %v1435_v50, 2  ;;  %v335_v17 = vrot.slane %v1446_v55, 2  ;;  %1092 = vmatpush1.msra.mxu1 %v619_v24  ;;  %676 = vmatpush1.msra.mxu0 %v617_v51 }
  0x32   : > { %1153 = vrot.lane.b32.xlu0 %v1152_v52, %s1285_s17  ;;  %1158 = vrot.lane.b32.xlu1 %v1157_v57, %s1284_s10  ;;  %v290_v13 = vsel %vm278_vm0, %v288_v56, %v289_v62  ;;  %v356_v18 = vrot.slane %v1419_v41, 3  ;;  %v302_v20 = vsel %vm278_vm0, %v300_v63, %v301_v9  ;;  %v357_v21 = vrot.slane %v1432_v49, 3 }
  0x33   : > { %v368_v22 = vrot.slane %v1435_v50, 3  ;;  %v369_v23 = vrot.slane %v1446_v55, 3  ;;  %v1172_v25 = vpack.i.bf16 %v355_v60, %v367_v61  ;;  %v1177_v26 = vpack.i.bf16 %v290_v13, %v302_v20  ;;  %1073 = vmatprep.subr.mxu1 %v1282_v1  ;;  %677 = vmatprep.subr.mxu0 %v1282_v1 }
  0x34   : > { %v324_v27 = vsel %vm312_vm2, %v322_v10, %v323_v11  ;;  %v336_v30 = vsel %vm312_vm2, %v334_v14, %v335_v17  ;;  %v358_v31 = vsel %vm346_vm1, %v356_v18, %v357_v21  ;;  %v291_v35 = vsel %vm278_vm0, %v289_v62, %v1356_v2  ;;  %1093 = vmatpush1.msra.mxu1 %v618_v37  ;;  %v615_v14 = vld [vmem:[%s1843_s1 + $0x30] sm:$0xff]  ;;  %v613_v37 = vld [vmem:[%s1843_s1 + $0x20] sm:$0xff] }
  0x35   : > { %v370_v32 = vsel %vm346_vm1, %v368_v22, %v369_v23  ;;  %v303_v36 = vsel %vm278_vm0, %v301_v9, %v1356_v2  ;;  %v325_v38 = vsel %vm312_vm2, %v323_v11, %v1368_v6  ;;  %v337_v39 = vsel %vm312_vm2, %v335_v17, %v1368_v6  ;;  %1074 = vmatprep.subr.mxu1 %v1282_v1 }
  0x36   : > { %1163 = vrot.lane.b32.xlu0 %v1162_v58, %s1283_s9  ;;  %1168 = vrot.lane.b32.xlu1 %v1167_v8, %s1285_s17  ;;  %v292_v40 = vrot.slane %v1487_v28, 1  ;;  %v293_v42 = vrot.slane %v1490_v29, 1  ;;  %v1182_v43 = vpack.i.bf16 %v324_v27, %v336_v30  ;;  %v1187_v44 = vpack.i.bf16 %v358_v31, %v370_v32  ;;  %v616_v8 = vld [vmem:[%s1843_s1 + $0x38] sm:$0xff] }
  0x37   : > { %v304_v45 = vrot.slane %v1496_v33, 1  ;;  %v305_v46 = vrot.slane %v1499_v34, 1  ;;  %v1192_v47 = vpack.i.bf16 %v291_v35, %v303_v36  ;;  %v1197_v48 = vpack.i.bf16 %v325_v38, %v337_v39  ;;  %678 = vmatpush1.msra.mxu0 %v616_v8  ;;  %1094 = vmatpush1.msra.mxu1 %v617_v51  ;;  %v1592_v35 = vld [vmem:[%s1353_s8 + $0x70] sm:$0xff]  ;;  %v1595_v36 = vld [vmem:[%s1353_s8 + $0x78] sm:$0xff] }
  0x38   : > { %v359_v52 = vsel %vm346_vm1, %v357_v21, %v1359_v3  ;;  %v371_v53 = vsel %vm346_vm1, %v369_v23, %v1359_v3  ;;  %v294_v54 = vsel %vm278_vm0, %v292_v40, %v293_v42  ;;  %v326_v56 = vrot.slane %v1487_v28, 2  ;;  %679 = vmatprep.subr.mxu0 %v1282_v1  ;;  %1075 = vmatprep.subr.mxu1 %v1282_v1  ;;  %v614_v23 = vld [vmem:[%s1843_s1 + $0x28] sm:$0xff]  ;;  %v612_v40 = vld [vmem:[%s1843_s1 + $0x18] sm:$0xff] }
  0x39   : > { %v306_v57 = vsel %vm278_vm0, %v304_v45, %v305_v46  ;;  %v327_v58 = vrot.slane %v1490_v29, 2  ;;  %v338_v59 = vrot.slane %v1496_v33, 2  ;;  %v339_v60 = vrot.slane %v1499_v34, 2  ;;  %680 = vmatpush1.msra.mxu0 %v615_v14  ;;  %1095 = vmatpush1.msra.mxu1 %v616_v8 }
  0x3a   : > { %1173 = vrot.lane.b32.xlu0 %v1172_v25, %s1284_s10  ;;  %1178 = vrot.lane.b32.xlu1 %v1177_v26, %s1283_s9  ;;  %v360_v61 = vrot.slane %v1487_v28, 3  ;;  %v361_v62 = vrot.slane %v1490_v29, 3  ;;  %v372_v63 = vrot.slane %v1496_v33, 3  ;;  %v373_v0 = vrot.slane %v1499_v34, 3 }
  0x3b   : > { %v1202_v9 = vpack.i.bf16 %v359_v52, %v371_v53  ;;  %v1207_v10 = vpack.i.bf16 %v294_v54, %v306_v57  ;;  %v328_v11 = vsel %vm312_vm2, %v326_v56, %v327_v58  ;;  %v340_v13 = vsel %vm312_vm2, %v338_v59, %v339_v60  ;;  %681 = vmatprep.subr.mxu0 %v1282_v1  ;;  %v610_v56 = vld [vmem:[%s1843_s1 + $0x8] sm:$0xff]  ;;  %v609_v57 = vld [vmem:[%s1843_s1] sm:$0xff] }
  0x3c   : > { %v362_v17 = vsel %vm346_vm1, %v360_v61, %v361_v62  ;;  %v374_v18 = vsel %vm346_vm1, %v372_v63, %v373_v0  ;;  %v382_v19 = vrot.slane %v1365_v5, 4  ;;  %v1560_v20 = vrot.slane %v1282_v1, 4  ;;  %682 = vmatpush1.msra.mxu0 %v614_v23  ;;  %1076 = vmatprep.subr.mxu1 %v1282_v1  ;;  %v627_v63 = vld [vmem:[%s1843_s1 + $0x90] sm:$0xff] }
  0x3d   : > { %v399_v21 = vrot.slane %v1386_v16, 4  ;;  %v1212_v22 = vpack.i.bf16 %v328_v11, %v340_v13  ;;  %v1217_v25 = vpack.i.bf16 %v362_v17, %v374_v18  ;;  %v295_v26 = vsel %vm278_vm0, %v293_v42, %v1356_v2  ;;  %683 = vmatprep.subr.mxu0 %v1282_v1  ;;  %1096 = vmatpush1.msra.mxu1 %v615_v14 }
  0x3e   : > { %1183 = vrot.lane.b32.xlu0 %v1182_v43, %s1285_s17  ;;  %1188 = vrot.lane.b32.xlu1 %v1187_v44, %s1284_s10  ;;  %v1572_v24 = vsel %vm380_vm3, %v382_v19, %v1560_v20  ;;  %v307_v30 = vsel %vm278_vm0, %v305_v46, %v1356_v2  ;;  %v329_v31 = vsel %vm312_vm2, %v327_v58, %v1368_v6  ;;  %v308_v44 = vrot.slane %v1592_v35, 1  ;;  %v611_v46 = vld [vmem:[%s1843_s1 + $0x10] sm:$0xff] }
  0x3f   : > { %v1582_v27 = vsel %vm380_vm3, %v399_v21, %v1560_v20  ;;  %v341_v32 = vsel %vm312_vm2, %v339_v60, %v1368_v6  ;;  %v1222_v38 = vpack.i.bf16 %v295_v26, %v307_v30  ;;  %v363_v42 = vsel %vm346_vm1, %v361_v62, %v1359_v3  ;;  %684 = vmatpush1.msra.mxu0 %v613_v37  ;;  %v628_v60 = vld [vmem:[%s1843_s1 + $0x98] sm:$0xff] }
  0x40   : > { %v1227_v39 = vpack.i.bf16 %v329_v31, %v341_v32  ;;  %v375_v43 = vsel %vm346_vm1, %v373_v0, %v1359_v3  ;;  %v309_v45 = vrot.slane %v1595_v36, 1  ;;  %1077 = vmatprep.subr.mxu1 %v1282_v1  ;;  %685 = vmatprep.subr.mxu0 %v1282_v1  ;;  %v343_v52 = vrot.slane %v1595_v36, 2 }
  0x41   : > { %1097 = vmatpush1.msra.mxu1 %v614_v23  ;;  %686 = vmatpush1.msra.mxu0 %v612_v40  ;;  %v376_v53 = vrot.slane %v1592_v35, 3  ;;  %v377_v54 = vrot.slane %v1595_v36, 3  ;;  %v381_v0 = vrot.slane %v1362_v4, 4  ;;  %v387_v32 = vrot.slane %v1378_v12, 4 }
  0x42   : > { %1193 = vrot.lane.b32.xlu0 %v1192_v47, %s1283_s9  ;;  %1198 = vrot.lane.b32.xlu1 %v1197_v48, %s1285_s17  ;;  %v1232_v47 = vpack.i.bf16 %v363_v42, %v375_v43  ;;  %v342_v48 = vrot.slane %v1592_v35, 2  ;;  %v310_v51 = vsel %vm278_vm0, %v308_v44, %v309_v45  ;;  %v311_v61 = vsel %vm278_vm0, %v309_v45, %v1356_v2  ;;  %v626_v2 = vld [vmem:[%s1843_s1 + $0x88] sm:$0xff] }
  0x43   : > { %1078 = vmatprep.subr.mxu1 %v1282_v1  ;;  %687 = vmatprep.subr.mxu0 %v1282_v1  ;;  %v378_v59 = vsel %vm346_vm1, %v376_v53, %v377_v54  ;;  %v345_v62 = vsel %vm312_vm2, %v343_v52, %v1368_v6  ;;  %v398_v6 = vrot.slane %v1383_v15, 4  ;;  %v379_v8 = vsel %vm346_vm1, %v377_v54, %v1359_v3 }
  0x44   : > { %1098 = vmatpush1.msra.mxu1 %v613_v37  ;;  %688 = vmatpush1.msra.mxu0 %v611_v46  ;;  %v344_v58 = vsel %vm312_vm2, %v342_v48, %v343_v52 }
  0x45   : > { %1079 = vmatprep.subr.mxu1 %v1282_v1  ;;  %689 = vmatprep.subr.mxu0 %v1282_v1  ;;  %v400_v3 = vsel %vm380_vm3, %v398_v6, %v399_v21 }
  0x46   : > { %1203 = vrot.lane.b32.xlu0 %v1202_v9, %s1284_s10  ;;  %1208 = vrot.lane.b32.xlu1 %v1207_v10, %s1283_s9  ;;  %v625_v9 = vld [vmem:[%s1843_s1 + $0x80] sm:$0xff]  ;;  %v383_v10 = vsel %vm380_vm3, %v381_v0, %v382_v19 }
  0x47   : > { %1099 = vmatpush1.msra.mxu1 %v612_v40  ;;  %690 = vmatpush1.msra.mxu0 %v610_v56 }
  0x48   : > { %1080 = vmatprep.subr.mxu1 %v1282_v1  ;;  %691 = vmatprep.subr.mxu0 %v1282_v1 }
  0x49   : > { %1100 = vmatpush1.msra.mxu1 %v611_v46  ;;  %692 = vmatpush1.msra.mxu0 %v609_v57 }
  0x4a   : > { %1213 = vrot.lane.b32.xlu0 %v1212_v22, %s1285_s17  ;;  %1218 = vrot.lane.b32.xlu1 %v1217_v25, %s1284_s10 }
  0x4b   : > { %1081 = vmatprep.subr.mxu1 %v1282_v1  ;;  %717 = vmatprep.subr.mxu0 %v1282_v1 }
  0x4c   : > { %1101 = vmatpush1.msra.mxu1 %v610_v56  ;;  %718 = vmatpush2.msra.mxu0 %v628_v60 }
  0x4d   : > { %1082 = vmatprep.subr.mxu1 %v1282_v1  ;;  %719 = vmatprep.subr.mxu0 %v1282_v1 }
  0x4e   : > { %1223 = vrot.lane.b32.xlu0 %v1222_v38, %s1283_s9  ;;  %1228 = vrot.lane.b32.xlu1 %v1227_v39, %s1285_s17 }
  0x4f   : > { %1102 = vmatpush1.msra.mxu1 %v609_v57  ;;  %720 = vmatpush2.msra.mxu0 %v627_v63 }
  0x50   : > { %1083 = vmatprep.subr.mxu1 %v1282_v1  ;;  %721 = vmatprep.subr.mxu0 %v1282_v1 }
  0x51   : > { %1103 = vmatpush2.msra.mxu1 %v628_v60  ;;  %722 = vmatpush2.msra.mxu0 %v626_v2  ;;  %v402_v60 = vrot.slane %v1435_v50, 4 }
  0x52   : > { %1233 = vrot.lane.b32.xlu0 %v1232_v47, %s1284_s10  ;;  %442 = vrot.lane.b32.xlu1 %v310_v51, %s1283_s9 }
  0x53   : > { %1084 = vmatprep.subr.mxu1 %v1282_v1  ;;  %723 = vmatprep.subr.mxu0 %v1282_v1 }
  0x54   : > { %1104 = vmatpush2.msra.mxu1 %v627_v63  ;;  %724 = vmatpush2.msra.mxu0 %v625_v9 }
  0x55   : > { %1045 = vmatprep.mubr.msk.f32.mxu0 %vm558_vm4, %v383_v10  ;;  %1085 = vmatprep.subr.mxu1 %v1282_v1 }
  0x56   : > { %490 = vrot.lane.b32.xlu0 %v344_v58, %s1285_s17  ;;  %538 = vrot.lane.b32.xlu1 %v378_v59, %s1284_s10  ;;  %v390_v58 = vrot.slane %v1419_v41, 4 }
  0x57   : > { %1105 = vmatpush2.msra.mxu1 %v626_v2  ;;  %1053 = vmatprep.mubr.msk.f32.mxu1 %vm558_vm4, %v400_v3  ;;  %v391_v2 = vrot.slane %v1432_v49, 4 }
  0x58   : > { %1086 = vmatprep.subr.mxu1 %v1282_v1  ;;  %v386_v1 = vrot.slane %v1371_v7, 4 }
  0x59   : > { %1106 = vmatpush2.msra.mxu1 %v625_v9 }
  0x5a   : > { %444 = vrot.lane.b32.xlu0 %v311_v61, %s1283_s9  ;;  %492 = vrot.lane.b32.xlu1 %v345_v62, %s1285_s17  ;;  %v403_v61 = vrot.slane %v1446_v55, 4  ;;  %v389_v62 = vsel %vm380_vm3, %v387_v32, %v1560_v20  ;;  %s1044_s17 = sshll.u32 %s1852_s21, 3 }
  0x5b   : > { %s244_s12 = scalar_lea.vmem %s1847_s5, %s1044_s17 }
  0x5e   : > { %540 = vrot.lane.b32.xlu0 %v379_v8, %s1284_s10 }
  0x9c   : > { %v1134_v11 = vpop.permute.xlu0 %1133  ;;  %v1144_v13 = vpop.permute.xlu1 %1143 }
  0x9d   : > { %v1135_v14 = vunpack.i.l.bf16 %v1134_v11  ;;  %v1136_v17 = vunpack.i.h.bf16 %v1134_v11  ;;  %v1145_v25 = vunpack.i.l.bf16 %v1144_v13  ;;  %v1146_v46 = vunpack.i.h.bf16 %v1144_v13 }
  0x9f   : > { %v559_v30 = vsel %vm558_vm4, %v1362_v4, %v1135_v14  ;;  %v560_v40 = vsel %vm558_vm4, %v1365_v5, %v1136_v17  ;;  %v388_v5 = vsel %vm380_vm3, %v386_v1, %v387_v32  ;;  %v404_v14 = vsel %vm380_vm3, %v402_v60, %v403_v61 }
  0xa0   : > { %v1139_v18 = vpop.permute.xlu0 %1138  ;;  %v1149_v19 = vpop.permute.xlu1 %1148 }
  0xa1   : > { %v1141_v21 = vunpack.i.h.bf16 %v1139_v18  ;;  %v1140_v22 = vunpack.i.l.bf16 %v1139_v18  ;;  %v1150_v23 = vunpack.i.l.bf16 %v1149_v19  ;;  %v1151_v26 = vunpack.i.h.bf16 %v1149_v19 }
  0xa2   : > { %v392_v18 = vsel %vm380_vm3, %v390_v58, %v391_v2 }
  0xa3   : > { %v576_v31 = vsel %vm575_vm5, %v559_v30, %v1140_v22  ;;  %v567_v42 = vsel %vm558_vm4, %v1383_v15, %v1150_v23  ;;  %v577_v4 = vsel %vm575_vm5, %v560_v40, %v1141_v21  ;;  %v561_v47 = vsel %vm558_vm4, %v1371_v7, %v1151_v26 }
  0xa4   : > { %v1154_v37 = vpop.permute.xlu0 %1153  ;;  %v1159_v38 = vpop.permute.xlu1 %1158  ;;  %v593_v39 = vsel %vm592_vm6, %v576_v31, %v1145_v25  ;;  %v594_v53 = vsel %vm592_vm6, %v577_v4, %v1146_v46 }
  0xa5   : > { %v1156_v43 = vunpack.i.h.bf16 %v1154_v37  ;;  %v1155_v44 = vunpack.i.l.bf16 %v1154_v37  ;;  %v1160_v45 = vunpack.i.l.bf16 %v1159_v38  ;;  %726 = vmatmul.mubr.f32.vlgmr.msra.gmra.mxu0 %v593_v39  ;;  %v1161_v51 = vunpack.i.h.bf16 %v1159_v38 }
  0xa6   : > { %1046 = vmatprep.mubr.msk.f32.mxu0 %vm558_vm4, %v1572_v24  ;;  %v393_v37 = vsel %vm380_vm3, %v391_v2, %v1560_v20 }
  0xa7   : > { %v584_v48 = vsel %vm575_vm5, %v567_v42, %v1155_v44  ;;  %v578_v24 = vsel %vm575_vm5, %v561_v47, %v1156_v43  ;;  %v394_v44 = vrot.slane %v1487_v28, 4  ;;  %v406_v47 = vrot.slane %v1496_v33, 4 }
  0xa8   : > { %v1164_v52 = vpop.permute.xlu0 %1163  ;;  %v1169_v15 = vpop.permute.xlu1 %1168  ;;  %v601_v54 = vsel %vm592_vm6, %v584_v48, %v1160_v45  ;;  %v595_v9 = vsel %vm592_vm6, %v578_v24, %v1161_v51  ;;  %v395_v45 = vrot.slane %v1490_v29, 4  ;;  %v407_v48 = vrot.slane %v1499_v34, 4 }
  0xa9   : > { %v1166_v56 = vunpack.i.h.bf16 %v1164_v52  ;;  %v1165_v57 = vunpack.i.l.bf16 %v1164_v52  ;;  %731 = vmatmul.mubr.f32.gmra.mxu0 %v594_v53  ;;  %766 = vmatmul.mubr.f32.vlgmr.msra.gmra.mxu1 %v601_v54  ;;  %v1171_v7 = vunpack.i.h.bf16 %v1169_v15  ;;  %v1170_v59 = vunpack.i.l.bf16 %v1169_v15 }
  0xaa   : > { %1047 = vmatprep.mubr.msk.f32.mxu0 %vm558_vm4, %v388_v5  ;;  %1054 = vmatprep.mubr.msk.f32.mxu1 %vm558_vm4, %v1582_v27 }
  0xab   : > { %v568_v63 = vsel %vm558_vm4, %v1386_v16, %v1165_v57  ;;  %v562_v0 = vsel %vm558_vm4, %v1378_v12, %v1166_v56 }
  0xac   : > { %v1174_v6 = vpop.permute.xlu0 %1173  ;;  %v1179_v8 = vpop.permute.xlu1 %1178  ;;  %v585_v13 = vsel %vm575_vm5, %v568_v63, %v1170_v59  ;;  %v579_v16 = vsel %vm575_vm5, %v562_v0, %v1171_v7  ;;  %v396_v7 = vsel %vm380_vm3, %v394_v44, %v395_v45  ;;  %v408_v59 = vsel %vm380_vm3, %v406_v47, %v407_v48 }
  0xad   : > { %v1176_v27 = vunpack.i.h.bf16 %v1174_v6  ;;  %v1175_v10 = vunpack.i.l.bf16 %v1174_v6  ;;  %v1181_v3 = vunpack.i.h.bf16 %v1179_v8  ;;  %v1180_v11 = vunpack.i.l.bf16 %v1179_v8  ;;  %736 = vmatmul.mubr.f32.gmra.mxu0 %v595_v9 }
  0xae   : > { %1048 = vmatprep.mubr.msk.f32.mxu0 %vm558_vm4, %v389_v62 }
  0xaf   : > { %v602_v12 = vsel %vm592_vm6, %v585_v13, %v1175_v10  ;;  %v596_v17 = vsel %vm592_vm6, %v579_v16, %v1176_v27  ;;  %v563_v22 = vsel %vm558_vm4, %v1419_v41, %v1181_v3  ;;  %v569_v23 = vsel %vm558_vm4, %v1435_v50, %v1180_v11 }
  0xb0   : > { %v1184_v19 = vpop.permute.xlu0 %1183  ;;  %771 = vmatmul.mubr.f32.gmra.mxu1 %v602_v12  ;;  %v1189_v21 = vpop.permute.xlu1 %1188  ;;  %v405_v41 = vsel %vm380_vm3, %v403_v61, %v1560_v20  ;;  %v397_v10 = vsel %vm380_vm3, %v395_v45, %v1560_v20 }
  0xb1   : > { %v1186_v25 = vunpack.i.h.bf16 %v1184_v19  ;;  %v1185_v26 = vunpack.i.l.bf16 %v1184_v19  ;;  %v1191_v30 = vunpack.i.h.bf16 %v1189_v21  ;;  %v1190_v31 = vunpack.i.l.bf16 %v1189_v21  ;;  %741 = vmatmul.mubr.f32.gmra.mxu0 %v596_v17  ;;  %1055 = vmatprep.mubr.msk.f32.mxu1 %vm558_vm4, %v404_v14 }
  0xb2   : > { %1049 = vmatprep.mubr.msk.f32.mxu0 %vm558_vm4, %v392_v18  ;;  %v410_v18 = vrot.slane %v1592_v35, 4  ;;  %v411_v19 = vrot.slane %v1595_v36, 4 }
  0xb3   : > { %v580_v1 = vsel %vm575_vm5, %v563_v22, %v1186_v25  ;;  %v586_v32 = vsel %vm575_vm5, %v569_v23, %v1185_v26 }
  0xb4   : > { %v1194_v50 = vpop.permute.xlu0 %1193  ;;  %v1199_v38 = vpop.permute.xlu1 %1198  ;;  %v597_v39 = vsel %vm592_vm6, %v580_v1, %v1191_v30  ;;  %v603_v40 = vsel %vm592_vm6, %v586_v32, %v1190_v31 }
  0xb5   : > { %v1196_v42 = vunpack.i.h.bf16 %v1194_v50  ;;  %v1195_v43 = vunpack.i.l.bf16 %v1194_v50  ;;  %746 = vmatmul.mubr.f32.gmra.mxu0 %v597_v39  ;;  %776 = vmatmul.mubr.f32.gmra.mxu1 %v603_v40  ;;  %v1201_v4 = vunpack.i.h.bf16 %v1199_v38  ;;  %v1200_v46 = vunpack.i.l.bf16 %v1199_v38 }
  0xb6   : > { %1050 = vmatprep.mubr.msk.f32.mxu0 %vm558_vm4, %v393_v37  ;;  %1056 = vmatprep.mubr.msk.f32.mxu1 %vm558_vm4, %v405_v41  ;;  %v412_v37 = vsel %vm380_vm3, %v410_v18, %v411_v19  ;;  %v413_v39 = vsel %vm380_vm3, %v411_v19, %v1560_v20 }
  0xb7   : > { %v564_v5 = vsel %vm558_vm4, %v1432_v49, %v1196_v42  ;;  %v570_v51 = vsel %vm558_vm4, %v1446_v55, %v1195_v43 }
  0xb8   : > { %v1204_v52 = vpop.permute.xlu0 %1203  ;;  %v1209_v15 = vpop.permute.xlu1 %1208  ;;  %v581_v24 = vsel %vm575_vm5, %v564_v5, %v1201_v4  ;;  %v587_v58 = vsel %vm575_vm5, %v570_v51, %v1200_v46 }
  0xb9   : > { %v1206_v53 = vunpack.i.h.bf16 %v1204_v52  ;;  %v1205_v54 = vunpack.i.l.bf16 %v1204_v52  ;;  %v1211_v56 = vunpack.i.h.bf16 %v1209_v15  ;;  %v1210_v57 = vunpack.i.l.bf16 %v1209_v15 }
  0xbb   : > { %v598_v60 = vsel %vm592_vm6, %v581_v24, %v1206_v53  ;;  %v604_v49 = vsel %vm592_vm6, %v587_v58, %v1205_v54  ;;  %v565_v62 = vsel %vm558_vm4, %v1487_v28, %v1211_v56  ;;  %v571_v63 = vsel %vm558_vm4, %v1496_v33, %v1210_v57  ;;  %v1794_v53 = vld [vmem:[#allocation3] sm:$0xff]  ;;  %v1796_v54 = vld [vmem:[#allocation3 + $0x8] sm:$0xff] }
  0xbc   : > { %v1214_v61 = vpop.permute.xlu0 %1213  ;;  %751 = vmatmul.mubr.f32.gmra.mxu0 %v598_v60  ;;  %781 = vmatmul.mubr.f32.gmra.mxu1 %v604_v49  ;;  %v1219_v55 = vpop.permute.xlu1 %1218  ;;  %v409_v28 = vsel %vm380_vm3, %v407_v48, %v1560_v20 }
  0xbd   : > { %v1216_v0 = vunpack.i.h.bf16 %v1214_v61  ;;  %v1215_v2 = vunpack.i.l.bf16 %v1214_v61  ;;  %v1221_v6 = vunpack.i.h.bf16 %v1219_v55  ;;  %v1220_v8 = vunpack.i.l.bf16 %v1219_v55  ;;  %1051 = vmatprep.mubr.msk.f32.mxu0 %vm558_vm4, %v396_v7  ;;  %1057 = vmatprep.mubr.msk.f32.mxu1 %vm558_vm4, %v408_v59 }
  0xbf   : > { %v582_v9 = vsel %vm575_vm5, %v565_v62, %v1216_v0  ;;  %v588_v27 = vsel %vm575_vm5, %v571_v63, %v1215_v2 }
  0xc0   : > { %v1224_v3 = vpop.permute.xlu0 %1223  ;;  %v1229_v33 = vpop.permute.xlu1 %1228  ;;  %v599_v11 = vsel %vm592_vm6, %v582_v9, %v1221_v6  ;;  %v605_v13 = vsel %vm592_vm6, %v588_v27, %v1220_v8 }
  0xc1   : > { %v1226_v16 = vunpack.i.h.bf16 %v1224_v3  ;;  %v1225_v14 = vunpack.i.l.bf16 %v1224_v3  ;;  %756 = vmatmul.mubr.f32.gmra.mxu0 %v599_v11  ;;  %786 = vmatmul.mubr.f32.gmra.mxu1 %v605_v13  ;;  %v1231_v12 = vunpack.i.h.bf16 %v1229_v33  ;;  %v1230_v17 = vunpack.i.l.bf16 %v1229_v33 }
  0xc2   : > { %1052 = vmatprep.mubr.msk.f32.mxu0 %vm558_vm4, %v397_v10  ;;  %1058 = vmatprep.mubr.msk.f32.mxu1 %vm558_vm4, %v409_v28 }
  0xc3   : > { %v566_v21 = vsel %vm558_vm4, %v1490_v29, %v1226_v16  ;;  %v572_v22 = vsel %vm558_vm4, %v1499_v34, %v1225_v14 }
  0xc4   : > { %v1234_v23 = vpop.permute.xlu0 %1233  ;;  %v443_v25 = vpop.permute.xlu1 %442  ;;  %v583_v1 = vsel %vm575_vm5, %v566_v21, %v1231_v12  ;;  %v589_v32 = vsel %vm575_vm5, %v572_v22, %v1230_v17 }
  0xc5   : > { %v1236_v26 = vunpack.i.h.bf16 %v1234_v23  ;;  %v1235_v30 = vunpack.i.l.bf16 %v1234_v23  ;;  %v573_v31 = vsel %vm558_vm4, %v1592_v35, %v443_v25 }
  0xc7   : > { %v600_v41 = vsel %vm592_vm6, %v583_v1, %v1236_v26  ;;  %v606_v29 = vsel %vm592_vm6, %v589_v32, %v1235_v30 }
  0xc8   : > { %v491_v50 = vpop.permute.xlu0 %490  ;;  %761 = vmatmul.mubr.f32.gmra.mxu0 %v600_v41  ;;  %791 = vmatmul.mubr.f32.gmra.mxu1 %v606_v29  ;;  %v539_v34 = vpop.permute.xlu1 %538 }
  0xc9   : > { %v590_v38 = vsel %vm575_vm5, %v573_v31, %v491_v50  ;;  %1059 = vmatprep.mubr.msk.f32.mxu1 %vm558_vm4, %v412_v37 }
  0xca   : > { %v607_v35 = vsel %vm592_vm6, %v590_v38, %v539_v34 }
  0xcc   : > { %v445_v40 = vpop.permute.xlu0 %444  ;;  %796 = vmatmul.mubr.f32.gmra.mxu1 %v607_v35  ;;  %v493_v43 = vpop.permute.xlu1 %492 }
  0xcd   : > { %v574_v42 = vsel %vm558_vm4, %v1595_v36, %v445_v40  ;;  %1060 = vmatprep.mubr.msk.f32.mxu1 %vm558_vm4, %v413_v39 }
  0xce   : > { %v591_v44 = vsel %vm575_vm5, %v574_v42, %v493_v43 }
  0xd0   : > { %v541_v45 = vpop.permute.xlu0 %540 }
  0xd1   : > { %v608_v4 = vsel %vm592_vm6, %v591_v44, %v541_v45 }
  0xd2   : > { %801 = vmatmul.mubr.f32.gmra.mxu1 %v608_v4 }
 0x165   : > { %v727_v46 = vpop.f32.mrf.mxu0 }
 0x166   : > { %v808_v0 = vadd.f32 %v1794_v53, %v727_v46 }
 0x167   : > { %v729_v47 = vpop.f32.mrf.mxu0 }
 0x168   : > { %v825_v28 = vsel %vm824_vm7, %v808_v0, -inf }
 0x169   : > { %v732_v48 = vpop.f32.mrf.mxu0  ;;  %v767_v5 = vpop.f32.mrf.mxu1 }
 0x16a   : > { %v809_v60 = vadd.f32 %v1796_v54, %v732_v48  ;;  %v816_v8 = vadd.f32 %v1794_v53, %v767_v5 }
 0x16b   : > { %v734_v51 = vpop.f32.mrf.mxu0  ;;  %v769_v20 = vpop.f32.mrf.mxu1 }
 0x16c   : > { %v826_v9 = vsel %vm824_vm7, %v809_v60, -inf  ;;  %v861_v13 = vsel %vm824_vm7, %v816_v8, -inf }
 0x16d   : > { %v737_v52 = vpop.f32.mrf.mxu0  ;;  %v827_v11 = vmax.f32 %v825_v28, %v826_v9 }
 0x16e   : > { %v810_v56 = vadd.f32 %v1794_v53, %v737_v52 }
 0x16f   : > { %v739_v15 = vpop.f32.mrf.mxu0  ;;  %v828_v31 = vrot.slane %v827_v11, 4 }
 0x170   : > { %v772_v36 = vpop.f32.mrf.mxu1  ;;  %v834_v49 = vsel %vm824_vm7, %v810_v56, -inf }
 0x171   : > { %v742_v57 = vpop.f32.mrf.mxu0  ;;  %v817_v62 = vadd.f32 %v1796_v54, %v772_v36  ;;  %v829_v39 = vmax.f32 %v827_v11, %v828_v31  ;;  %v1061_v31 = vld [vmem:[%s1845_s3] ss:$0 sm:$0xff] }
 0x172   : > { %v811_v24 = vadd.f32 %v1796_v54, %v742_v57  ;;  %v774_v58 = vpop.f32.mrf.mxu1 }
 0x173   : > { %v744_v7 = vpop.f32.mrf.mxu0  ;;  %v862_v27 = vsel %vm824_vm7, %v817_v62, -inf  ;;  %v830_v47 = vrot.slane %v829_v39, 2 }
 0x174   : > { %v835_v59 = vsel %vm824_vm7, %v811_v24, -inf  ;;  %v863_v12 = vmax.f32 %v861_v13, %v862_v27 }
 0x175   : > { %v747_v61 = vpop.f32.mrf.mxu0  ;;  %v777_v55 = vpop.f32.mrf.mxu1  ;;  %v836_v63 = vmax.f32 %v834_v49, %v835_v59 }
 0x176   : > { %v812_v3 = vadd.f32 %v1794_v53, %v747_v61  ;;  %v818_v33 = vadd.f32 %v1794_v53, %v777_v55  ;;  %v864_v37 = vrot.slane %v863_v12, 4  ;;  %v831_v61 = vmax.f32 %v829_v39, %v830_v47 }
 0x177   : > { %v749_v2 = vpop.f32.mrf.mxu0  ;;  %v779_v6 = vpop.f32.mrf.mxu1  ;;  %v837_v10 = vrot.slane %v836_v63, 4 }
 0x178   : > { %v843_v23 = vsel %vm824_vm7, %v812_v3, -inf  ;;  %v870_v25 = vsel %vm824_vm7, %v818_v33, -inf  ;;  %v865_v43 = vmax.f32 %v863_v12, %v864_v37  ;;  %v832_v28 = vrot.slane %v831_v61, 1 }
 0x179   : > { %v838_v19 = vmax.f32 %v836_v63, %v837_v10 }
 0x17a   : > { %v866_v52 = vrot.slane %v865_v43, 2 }
 0x17b   : > { %v839_v50 = vrot.slane %v838_v19, 2 }
 0x17c   : > { %v752_v16 = vpop.f32.mrf.mxu0  ;;  %v782_v14 = vpop.f32.mrf.mxu1  ;;  %v867_v2 = vmax.f32 %v865_v43, %v866_v52 }
 0x17d   : > { %v813_v17 = vadd.f32 %v1796_v54, %v752_v16  ;;  %v819_v18 = vadd.f32 %v1796_v54, %v782_v14  ;;  %v840_v44 = vmax.f32 %v838_v19, %v839_v50 }
 0x17e   : > { %v754_v21 = vpop.f32.mrf.mxu0  ;;  %v784_v22 = vpop.f32.mrf.mxu1  ;;  %v868_v13 = vrot.slane %v867_v2, 1 }
 0x17f   : > { %v844_v26 = vsel %vm824_vm7, %v813_v17, -inf  ;;  %v871_v30 = vsel %vm824_vm7, %v819_v18, -inf  ;;  %v841_v56 = vrot.slane %v840_v44, 1  ;;  %v833_v22 = vmax.f32 %v831_v61, %v832_v28 }
 0x180   : > { %v845_v1 = vmax.f32 %v843_v23, %v844_v26  ;;  %v872_v32 = vmax.f32 %v870_v25, %v871_v30 }
 0x181   : > { %v757_v41 = vpop.f32.mrf.mxu0  ;;  %v787_v29 = vpop.f32.mrf.mxu1  ;;  %v842_v6 = vmax.f32 %v840_v44, %v841_v56 }
 0x182   : > { %v846_v34 = vrot.slane %v845_v1, 4  ;;  %v873_v42 = vrot.slane %v872_v32, 4  ;;  %v814_v4 = vadd.f32 %v1794_v53, %v757_v41  ;;  %v820_v46 = vadd.f32 %v1794_v53, %v787_v29 }
 0x183   : > { %v759_v38 = vpop.f32.mrf.mxu0  ;;  %v789_v35 = vpop.f32.mrf.mxu1  ;;  %v898_v14 = vmax.f32 %v842_v6, 0.0 }
 0x184   : > { %v847_v40 = vmax.f32 %v845_v1, %v846_v34  ;;  %v874_v5 = vmax.f32 %v872_v32, %v873_v42  ;;  %v852_v57 = vsel %vm824_vm7, %v814_v4, -inf  ;;  %v879_v59 = vsel %vm824_vm7, %v820_v46, -inf }
 0x185   : > { %v869_v1 = vmax.f32 %v867_v2, %v868_v13  ;;  %v913_v37 = vmul.f32 %v1061_v31, %v898_v14 }
 0x186   : > { %v848_v45 = vrot.slane %v847_v40, 2  ;;  %v875_v55 = vrot.slane %v874_v5, 2 }
 0x187   : > { %v928_v42 = vrot.slane %v913_v37, 7 }
 0x188   : > { %v849_v48 = vmax.f32 %v847_v40, %v848_v45  ;;  %v762_v51 = vpop.f32.mrf.mxu0  ;;  %v792_v20 = vpop.f32.mrf.mxu1  ;;  %v876_v3 = vmax.f32 %v874_v5, %v875_v55  ;;  %v901_v40 = vmax.f32 %v869_v1, 0.0 }
 0x189   : > { %v815_v15 = vadd.f32 %v1796_v54, %v762_v51  ;;  %v821_v36 = vadd.f32 %v1796_v54, %v792_v20 }
 0x18a   : > { %v764_v24 = vpop.f32.mrf.mxu0  ;;  %v794_v58 = vpop.f32.mrf.mxu1  ;;  %v850_v7 = vrot.slane %v849_v48, 1  ;;  %v877_v23 = vrot.slane %v876_v3, 1  ;;  %v916_v51 = vmul.f32 %v1061_v31, %v901_v40 }
 0x18b   : > { %v853_v60 = vsel %vm824_vm7, %v815_v15, -inf  ;;  %v880_v49 = vsel %vm824_vm7, %v821_v36, -inf }
 0x18c   : > { %v854_v62 = vmax.f32 %v852_v57, %v853_v60  ;;  %v881_v63 = vmax.f32 %v879_v59, %v880_v49  ;;  %v797_v0 = vpop.f32.mrf.mxu1  ;;  %v851_v10 = vmax.f32 %v849_v48, %v850_v7  ;;  %v878_v38 = vmax.f32 %v876_v3, %v877_v23 }
 0x18d   : > { %v822_v16 = vadd.f32 %v1794_v53, %v797_v0  ;;  %v937_v7 = vrot.slane %v916_v51, 4 }
 0x18e   : > { %v855_v8 = vrot.slane %v854_v62, 4  ;;  %v882_v9 = vrot.slane %v881_v63, 4  ;;  %v799_v27 = vpop.f32.mrf.mxu1  ;;  %v899_v19 = vmax.f32 %v851_v10, 0.0  ;;  %v902_v47 = vmax.f32 %v878_v38, 0.0 }
 0x18f   : > { %v888_v32 = vsel %vm824_vm7, %v822_v16, -inf  ;;  %v1062_v27 = vld [vmem:[#allocation2] ss:$0 sm:$0xff] }
 0x190   : > { %v856_v33 = vmax.f32 %v854_v62, %v855_v8  ;;  %v883_v11 = vmax.f32 %v881_v63, %v882_v9  ;;  %v914_v50 = vmul.f32 %v1061_v31, %v899_v19  ;;  %v917_v24 = vmul.f32 %v1061_v31, %v902_v47 }
 0x192   : > { %v857_v12 = vrot.slane %v856_v33, 2  ;;  %v884_v17 = vrot.slane %v883_v11, 2  ;;  %v802_v18 = vpop.f32.mrf.mxu1  ;;  %v931_v45 = vrot.slane %v914_v50, 6  ;;  %v940_v55 = vrot.slane %v917_v24, 3 }
 0x193   : > { %v823_v21 = vadd.f32 %v1796_v54, %v802_v18  ;;  %v897_v54 = vmax.f32 %v833_v22, 0.0 }
 0x194   : > { %v858_v25 = vmax.f32 %v856_v33, %v857_v12  ;;  %v885_v26 = vmax.f32 %v883_v11, %v884_v17  ;;  %v804_v30 = vpop.f32.mrf.mxu1 }
 0x195   : > { %v889_v53 = vsel %vm824_vm7, %v823_v21, -inf  ;;  %v912_v46 = vmul.f32 %v1061_v31, %v897_v54 }
 0x196   : > { %v859_v41 = vrot.slane %v858_v25, 1  ;;  %v890_v29 = vmax.f32 %v888_v32, %v889_v53  ;;  %v886_v34 = vrot.slane %v885_v26, 1 }
 0x197   : > { %v930_v15 = vsel %vm929_vm8, %v928_v42, %v912_v46 }
 0x198   : > { %v860_v35 = vmax.f32 %v858_v25, %v859_v41  ;;  %v891_v39 = vrot.slane %v890_v29, 4  ;;  %v887_v4 = vmax.f32 %v885_v26, %v886_v34  ;;  %v933_v56 = vsel %vm932_vm9, %v931_v45, %v930_v15 }
 0x19a   : > { %v900_v43 = vmax.f32 %v860_v35, 0.0  ;;  %v892_v44 = vmax.f32 %v890_v29, %v891_v39  ;;  %v903_v36 = vmax.f32 %v887_v4, 0.0 }
 0x19c   : > { %v915_v48 = vmul.f32 %v1061_v31, %v900_v43  ;;  %v893_v5 = vrot.slane %v892_v44, 2  ;;  %v918_v60 = vmul.f32 %v1061_v31, %v903_v36 }
 0x19e   : > { %v934_v20 = vrot.slane %v915_v48, 5  ;;  %v894_v52 = vmax.f32 %v892_v44, %v893_v5  ;;  %v943_v0 = vrot.slane %v918_v60, 2 }
 0x1a0   : > { %v895_v57 = vrot.slane %v894_v52, 1  ;;  %v936_v58 = vsel %vm935_vm10, %v934_v20, %v933_v56 }
 0x1a1   : > { %v939_v49 = vsel %vm938_vm11, %v937_v7, %v936_v58 }
 0x1a2   : > { %v896_v59 = vmax.f32 %v894_v52, %v895_v57  ;;  %v942_v63 = vsel %vm941_vm12, %v940_v55, %v939_v49 }
 0x1a3   : > { %v945_v6 = vsel %vm944_vm13, %v943_v0, %v942_v63 }
 0x1a4   : > { %v904_v61 = vmax.f32 %v896_v59, 0.0 }
 0x1a6   : > { %v919_v62 = vmul.f32 %v1061_v31, %v904_v61 }
 0x1a8   : > { %v946_v2 = vrot.slane %v919_v62, 1 }
 0x1aa   : > { %v948_v8 = vsel %vm947_vm14, %v946_v2, %v945_v6 }
 0x1ab   : > { %v950_v9 = vsel %vm824_vm7, %v948_v8, 0.0 }
 0x1ac   : > { %951 = vadd.xlane.f32.xlu1 %v950_v9 }
 0x235   : > { %v952_v10 = vpop.xlane.xlu1 %951 }
 0x236   : > { %v960_v28 = vadd.f32 %v1062_v27, %v952_v10 }
 0x238   : > { %v1063_v3 = vmul.f32 -1.442695, %v960_v28 }
 0x23a   : > { %1237 = vpow2.f32 %v1063_v3 }
 0x247   : > { %v1238_v33 = vpop.eup %1237 }
 0x248   : > { %v964_v11 = vadd.f32 1.0, %v1238_v33 }
 0x24a   : > { %1239 = vrcp.f32 %v964_v11 }
 0x257   : > { %v1240_v13 = vpop.eup %1239 }
 0x258   : > { %968 = vst.msk [vmem:[%s244_s12] sm:$0xff] %vm967_vm15, %v1240_v13 }
 0x259 PF: > { %s18_s20 = sadd.s32 1, %s1277_s20  }
 0x25a   : > { %p15_p2 = scmp.ge.s32.totalorder %s18_s20, 4  }
 0x25c   :  { %17 = sbr.rel (!%p15_p2) target bundleno = 4 (0x4), region = 75 }
 0x261   :  { %988 = vsyncpa [#allocation4], 1 }
 0x262   :  { %990 = vsyncpa [#allocation4 + $0x1], 1 }

</bundles_post_ra>
